<compile_context>
chip_gen: v7x
topology: tpu7x:2x2x1
jax: 0.10.0
libtpu: 0.0.40
codegen_flags: <defaults>
</compile_context>

<pallas_src>
import functools

import jax
import jax.numpy as jnp
from jax.experimental import pallas as pl
from jax.experimental.pallas import tpu as pltpu

_LANE = 128
_SUB = 8


def _round_up(x, m):
    return (x + m - 1) // m * m


# ---------------------------------------------------------------------------
# One-time parameter packing (run OUTSIDE the solver loop).
# ---------------------------------------------------------------------------
def pack_params(params_ode, w1, b1, w2, b2, w3, b3):
    """Pack all weights (feature-major) + mechanistic coefficients [alpha, -delta]
    into a single (8,128)-aligned f32 buffer -> one resident DMA per kernel call.
    Returns (packed, (H1, H2))."""
    in_dim, H1 = w1.shape
    H1b, H2 = w2.shape
    H2b, out_dim = w3.shape
    assert in_dim == 2 and out_dim == 2, "kernel hard-codes state dimension = 2"
    assert H1b == H1 and H2b == H2, "inconsistent hidden sizes"

    r2 = _round_up(H1, _SUB)                 # row offset of layer-2 block
    r3 = r2 + _round_up(H2, _SUB)            # row offset of layer-3 + coef block
    PR = _round_up(r3 + 2, _SUB)             # sublane-aligned rows
    PW = _round_up(max(3, H1 + 1, H2 + 2), _LANE)   # lane-aligned cols

    P = jnp.zeros((PR, PW), jnp.float32)
    # layer 1: [W1^T | b1]
    P = P.at[0:H1, 0:2].set(w1.T.astype(jnp.float32))
    P = P.at[0:H1, 2].set(b1.reshape(-1).astype(jnp.float32))
    # layer 2: [W2^T | b2]
    P = P.at[r2:r2 + H2, 0:H1].set(w2.T.astype(jnp.float32))
    P = P.at[r2:r2 + H2, H1].set(b2.reshape(-1).astype(jnp.float32))
    # layer 3: [W3^T | b3 | coef]
    P = P.at[r3:r3 + 2, 0:H2].set(w3.T.astype(jnp.float32))
    P = P.at[r3:r3 + 2, H2].set(b3.reshape(-1).astype(jnp.float32))
    coef = jnp.stack([params_ode[0], -params_ode[1]]).astype(jnp.float32)
    P = P.at[r3:r3 + 2, H2 + 1].set(coef)
    return P, (H1, H2)


# ---------------------------------------------------------------------------
# In-kernel right-hand side (shared by the forward and fused-RK4 kernels).
# ---------------------------------------------------------------------------
def _rhs(yT, p_ref, H1, H2, cd):
    """dy/dt for a feature-major (2, TB) state tile. `cd` = matmul compute dtype."""
    r2 = _round_up(H1, _SUB)
    r3 = r2 + _round_up(H2, _SUB)

    y0 = yT[0:1, :]                          # (1, TB)
    y1 = yT[1:2, :]

    # layer 1 (K=2): VPU outer product (2 broadcast FMAs), MXU stays off-path.
    h = jnp.tanh(p_ref[0:H1, 0:1] * y0
                 + p_ref[0:H1, 1:2] * y1
                 + p_ref[0:H1, 2:3])                                   # (H1, TB)

    # layer 2: MXU matmul, batch on the 128-lane axis.
    h = jnp.tanh(
        jnp.dot(p_ref[r2:r2 + H2, 0:H1].astype(cd), h.astype(cd),
                preferred_element_type=jnp.float32)
        + p_ref[r2:r2 + H2, H1:H1 + 1])                                # (H2, TB)

    # layer 3 + mechanistic term.
    net = (jnp.dot(p_ref[r3:r3 + 2, 0:H2].astype(cd), h.astype(cd),
                   preferred_element_type=jnp.float32)
           + p_ref[r3:r3 + 2, H2:H2 + 1])                              # (2, TB)
    mech = p_ref[r3:r3 + 2, H2 + 1:H2 + 2] * yT                        # [a*S1; -d*S2]
    return mech + net


def _forward_kernel(y_ref, p_ref, out_ref, *, H1, H2, cd):
    out_ref[...] = _rhs(y_ref[...], p_ref, H1, H2, cd)


def _rk4_kernel(dt_ref, y_ref, p_ref, out_ref, *, H1, H2, cd):
    """Fused classic RK4 step: 4 RHS evaluations + update, state stays in VMEM."""
    dt = dt_ref[0]
    y = y_ref[...]
    k1 = _rhs(y, p_ref, H1, H2, cd)
    k2 = _rhs(y + 0.5 * dt * k1, p_ref, H1, H2, cd)
    k3 = _rhs(y + 0.5 * dt * k2, p_ref, H1, H2, cd)
    k4 = _rhs(y + dt * k3, p_ref, H1, H2, cd)
    out_ref[...] = y + (dt / 6.0) * (k1 + 2.0 * k2 + 2.0 * k3 + k4)


# ---------------------------------------------------------------------------
# Tiling: large lane tiles (amortize ~0.35us/step), >=2 tiles when the batch
# allows so the batch axis can shard across v7x's two TensorCores.
# ---------------------------------------------------------------------------
def _tile(Bp):
    if Bp <= _LANE:
        return _LANE
    return min(2048, _round_up((Bp + 1) // 2, _LANE))


# ---------------------------------------------------------------------------
# Feature-major forward: use this inside a solver loop (no transposes).
# ---------------------------------------------------------------------------
def hybrid_ode_forward_fm(t, yT, packed, hidden, compute_dtype=jnp.float32):
    """yT: (2, B) float32, feature-major.  Returns dy/dt as (2, B)."""
    del t  # unused, as in the reference module
    H1, H2 = hidden
    PR, PW = packed.shape
    Bp = yT.shape[1]
    TB = _tile(Bp)
    Bpad = _round_up(Bp, TB)
    if Bpad != Bp:
        yT = jnp.pad(yT, ((0, 0), (0, Bpad - Bp)))

    out = pl.pallas_call(
        functools.partial(_forward_kernel, H1=H1, H2=H2, cd=compute_dtype),
        out_shape=jax.ShapeDtypeStruct((2, Bpad), jnp.float32),
        grid=(Bpad // TB,),
        in_specs=[
            pl.BlockSpec((2, TB), lambda i: (0, i)),      # batch tile
            pl.BlockSpec((PR, PW), lambda i: (0, 0)),     # weights: resident
        ],
        out_specs=pl.BlockSpec((2, TB), lambda i: (0, i)),
        compiler_params=pltpu.CompilerParams(
            dimension_semantics=("parallel",)),
    )(yT, packed)
    return out[:, :Bp] if Bpad != Bp else out


def hybrid_ode_forward(t, y, packed, hidden, compute_dtype=jnp.float32):
    """PyTorch-convention wrapper: y is (B, 1, 2); returns (B, 1, 2).
    Prefer `hybrid_ode_forward_fm` (feature-major state) in solver loops."""
    B = y.shape[0]
    yT = y.reshape(B, 2).astype(jnp.float32).T
    out = hybrid_ode_forward_fm(t, yT, packed, hidden, compute_dtype)
    return out.T.reshape(B, 1, 2)


# ---------------------------------------------------------------------------
# Fused RK4 step: the whole solver stage in one pallas_call.
# ---------------------------------------------------------------------------
def hybrid_ode_rk4_step(yT, dt, packed, hidden, compute_dtype=jnp.float32):
    """yT: (2, B) float32.  Returns y(t+dt) as (2, B) via classic RK4."""
    H1, H2 = hidden
    PR, PW = packed.shape
    Bp = yT.shape[1]
    TB = _tile(Bp)
    Bpad = _round_up(Bp, TB)
    if Bpad != Bp:
        yT = jnp.pad(yT, ((0, 0), (0, Bpad - Bp)))
    dt_arr = jnp.asarray(dt, jnp.float32).reshape(1)

    grid_spec = pltpu.PrefetchScalarGridSpec(
        num_scalar_prefetch=1,                      # dt lands in SMEM
        grid=(Bpad // TB,),
        in_specs=[
            pl.BlockSpec((2, TB), lambda i, dt: (0, i)),
            pl.BlockSpec((PR, PW), lambda i, dt: (0, 0)),
        ],
        out_specs=pl.BlockSpec((2, TB), lambda i, dt: (0, i)),
    )
    out = pl.pallas_call(
        functools.partial(_rk4_kernel, H1=H1, H2=H2, cd=compute_dtype),
        out_shape=jax.ShapeDtypeStruct((2, Bpad), jnp.float32),
        grid_spec=grid_spec,
        compiler_params=pltpu.CompilerParams(
            dimension_semantics=("parallel",)),
    )(dt_arr, yT, packed)
    return out[:, :Bp] if Bpad != Bp else out


# ---------------------------------------------------------------------------
# Init + pure-JAX references.
# ---------------------------------------------------------------------------
def init_params(structure, p0, key):
    """Mirror the module __init__: Linear weights ~ N(0, 0.1), biases = 0,
    paramsODE = [p0[0], p0[-1]] = [alpha, delta]. Weights stored (in, out)."""
    input_dim, output_dim, hidden = structure
    h1, h2 = hidden
    k1, k2, k3 = jax.random.split(key, 3)
    w1 = 0.1 * jax.random.normal(k1, (input_dim, h1), jnp.float32)
    b1 = jnp.zeros((h1,), jnp.float32)
    w2 = 0.1 * jax.random.normal(k2, (h1, h2), jnp.float32)
    b2 = jnp.zeros((h2,), jnp.float32)
    w3 = 0.1 * jax.random.normal(k3, (h2, output_dim), jnp.float32)
    b3 = jnp.zeros((output_dim,), jnp.float32)
    params_ode = jnp.array([p0[0], p0[-1]], jnp.float32)   # [alpha, delta]
    return params_ode, w1, b1, w2, b2, w3, b3


def _reference(y, params_ode, w1, b1, w2, b2, w3, b3):
    B = y.shape[0]
    y2d = y.reshape(B, 2).astype(jnp.float32)
    h = jnp.tanh(y2d @ w1 + b1)
    h = jnp.tanh(h @ w2 + b2)
    net = h @ w3 + b3
    mech = jnp.stack([params_ode[0] * y2d[:, 0], -params_ode[1] * y2d[:, 1]], axis=1)
    return (mech + net).reshape(B, 1, 2)


def _reference_fm(yT, *params):
    B = yT.shape[1]
    return _reference(yT.T.reshape(B, 1, 2), *params).reshape(B, 2).T


def _rk4_reference(yT, dt, *params):
    k1 = _reference_fm(yT, *params)
    k2 = _reference_fm(yT + 0.5 * dt * k1, *params)
    k3 = _reference_fm(yT + 0.5 * dt * k2, *params)
    k4 = _reference_fm(yT + dt * k3, *params)
    return yT + (dt / 6.0) * (k1 + 2.0 * k2 + 2.0 * k3 + k4)


if __name__ == "__main__":
    key = jax.random.PRNGKey(0)
    ky, kp = jax.random.split(key)

    structure = (2, 2, [32, 32])        # state dim 2, two hidden layers of 32
    p0 = [1.3, 0.9, 0.8, 1.8]           # alpha = p0[0], delta = p0[-1]
    params = init_params(structure, p0, kp)
    packed, hidden = pack_params(*params)   # packed ONCE, reused for every call
    t = jnp.float32(0.0)

    # 1) PyTorch-convention path: small batch (1 tile) + larger batch (2-tile grid).
    for salt, B in ((0, 8), (1, 1024)):
        yb = jax.random.uniform(jax.random.fold_in(ky, salt), (B, 1, 2),
                                jnp.float32, minval=0.5, maxval=2.0)
        out = jax.block_until_ready(hybrid_ode_forward(t, yb, packed, hidden))
        ref = _reference(yb, *params)
        assert out.shape == (B, 1, 2)
        assert jnp.allclose(out, ref, atol=1e-4, rtol=1e-4), f"mismatch at B={B}"

    # 2) Feature-major (solver-loop) path: no per-call transpose/pad/slice.
    B = 512
    y2 = jax.random.uniform(jax.random.fold_in(ky, 2), (B, 1, 2),
                            jnp.float32, minval=0.5, maxval=2.0)
    yT = y2.reshape(B, 2).T                                      # done once
    dy = jax.block_until_ready(hybrid_ode_forward_fm(t, yT, packed, hidden))
    ref_fm = _reference_fm(yT, *params)
    assert jnp.allclose(dy, ref_fm, atol=1e-4, rtol=1e-4), "FM forward mismatch"

    # 3) Fused RK4 solver stage: 4 RHS evaluations + update in one pallas_call.
    dt = 0.01
    y_next = jax.block_until_ready(hybrid_ode_rk4_step(yT, dt, packed, hidden))
    ref_next = _rk4_reference(yT, dt, *params)
    assert jnp.allclose(y_next, ref_next, atol=1e-4, rtol=1e-4), "RK4 step mismatch"

    # 4) bf16 matmul-input path for v6e/v7x (looser tolerance); keep f32 on v5e.
    kind = jax.devices()[0].device_kind.lower()
    if "v5" not in kind:
        dy_bf16 = jax.block_until_ready(
            hybrid_ode_forward_fm(t, yT, packed, hidden, compute_dtype=jnp.bfloat16))
        assert jnp.allclose(dy_bf16, ref_fm, atol=3e-2, rtol=3e-2), "bf16 path mismatch"

    # TODO(synk): adaptive-step solvers (error control, dt rejection) remain a
    # caller-level loop around hybrid_ode_rk4_step / hybrid_ode_forward_fm.
    print("KERNEL_OK")
</pallas_src>

<mosaic_0001>
module attributes {stable_mosaic.version = 11 : i64} {
  func.func @_forward_kernel(%arg0: i32, %arg1: memref<2x128xf32, #tpu.memory_space<vmem>>, %arg2: memref<72x128xf32, #tpu.memory_space<vmem>>, %arg3: memref<2x128xf32, #tpu.memory_space<vmem>>) attributes {dimension_semantics = [#tpu.dimension_semantics<parallel>], iteration_bounds = array<i64: 1>, scalar_prefetch = 0 : i64, scratch_operands = 0 : i64, tpu.core_type = #tpu.core_type<tc>, window_params = [{transform_indices = @transform_0, window_bounds = array<i64: 2, 128>}, {pipeline_mode = #tpu.pipeline_mode<synchronous>, transform_indices = @transform_1, window_bounds = array<i64: 72, 128>}, {transform_indices = @transform_2, window_bounds = array<i64: 2, 128>}]} {
    %c0 = arith.constant 0 : index
    %c0_0 = arith.constant 0 : index
    %0 = vector.load %arg1[%c0, %c0_0] : memref<2x128xf32, #tpu.memory_space<vmem>>, vector<2x128xf32>
    %1 = vector.extract_strided_slice %0 {offsets = [0, 0], sizes = [1, 128], strides = [1, 1]} : vector<2x128xf32> to vector<1x128xf32>
    %2 = vector.extract_strided_slice %0 {offsets = [1, 0], sizes = [1, 128], strides = [1, 1]} : vector<2x128xf32> to vector<1x128xf32>
    %c0_1 = arith.constant 0 : index
    %c0_2 = arith.constant 0 : index
    %3 = vector.load %arg2[%c0_1, %c0_2] : memref<72x128xf32, #tpu.memory_space<vmem>>, vector<32x1xf32>
    %4 = vector.broadcast %3 : vector<32x1xf32> to vector<32x128xf32>
    %5 = vector.broadcast %1 : vector<1x128xf32> to vector<32x128xf32>
    %6 = arith.mulf %4, %5 : vector<32x128xf32>
    %c0_3 = arith.constant 0 : index
    %c1 = arith.constant 1 : index
    %7 = vector.load %arg2[%c0_3, %c1] : memref<72x128xf32, #tpu.memory_space<vmem>>, vector<32x1xf32>
    %8 = vector.broadcast %7 : vector<32x1xf32> to vector<32x128xf32>
    %9 = vector.broadcast %2 : vector<1x128xf32> to vector<32x128xf32>
    %10 = arith.mulf %8, %9 : vector<32x128xf32>
    %11 = arith.addf %6, %10 : vector<32x128xf32>
    %c0_4 = arith.constant 0 : index
    %c2 = arith.constant 2 : index
    %12 = vector.load %arg2[%c0_4, %c2] : memref<72x128xf32, #tpu.memory_space<vmem>>, vector<32x1xf32>
    %13 = vector.broadcast %12 : vector<32x1xf32> to vector<32x128xf32>
    %14 = arith.addf %11, %13 : vector<32x128xf32>
    %15 = math.tanh %14 : vector<32x128xf32>
    %c32 = arith.constant 32 : index
    %c0_5 = arith.constant 0 : index
    %16 = vector.load %arg2[%c32, %c0_5] : memref<72x128xf32, #tpu.memory_space<vmem>>, vector<32x32xf32>
    %cst = arith.constant dense<0.000000e+00> : vector<32x128xf32>
    %17 = tpu.matmul %16, %15, %cst {dimension_numbers = #tpu.dot_dimension_numbers<[1], [0], [0], [1], [0, 0, 1, 1], [], []>} : vector<32x32xf32>, vector<32x128xf32>, vector<32x128xf32> -> vector<32x128xf32>
    %c32_6 = arith.constant 32 : index
    %c32_7 = arith.constant 32 : index
    %18 = vector.load %arg2[%c32_6, %c32_7] : memref<72x128xf32, #tpu.memory_space<vmem>>, vector<32x1xf32>
    %19 = vector.broadcast %18 : vector<32x1xf32> to vector<32x128xf32>
    %20 = arith.addf %17, %19 : vector<32x128xf32>
    %21 = math.tanh %20 : vector<32x128xf32>
    %c64 = arith.constant 64 : index
    %c0_8 = arith.constant 0 : index
    %22 = vector.load %arg2[%c64, %c0_8] : memref<72x128xf32, #tpu.memory_space<vmem>>, vector<2x32xf32>
    %cst_9 = arith.constant dense<0.000000e+00> : vector<2x128xf32>
    %23 = tpu.matmul %22, %21, %cst_9 {dimension_numbers = #tpu.dot_dimension_numbers<[1], [0], [0], [1], [0, 0, 1, 1], [], []>} : vector<2x32xf32>, vector<32x128xf32>, vector<2x128xf32> -> vector<2x128xf32>
    %c64_10 = arith.constant 64 : index
    %c32_11 = arith.constant 32 : index
    %24 = vector.load %arg2[%c64_10, %c32_11] : memref<72x128xf32, #tpu.memory_space<vmem>>, vector<2x1xf32>
    %25 = vector.broadcast %24 : vector<2x1xf32> to vector<2x128xf32>
    %26 = arith.addf %23, %25 : vector<2x128xf32>
    %c64_12 = arith.constant 64 : index
    %c33 = arith.constant 33 : index
    %27 = vector.load %arg2[%c64_12, %c33] : memref<72x128xf32, #tpu.memory_space<vmem>>, vector<2x1xf32>
    %28 = vector.broadcast %27 : vector<2x1xf32> to vector<2x128xf32>
    %29 = arith.mulf %28, %0 : vector<2x128xf32>
    %30 = arith.addf %29, %26 : vector<2x128xf32>
    %c0_13 = arith.constant 0 : index
    %c0_14 = arith.constant 0 : index
    %31 = vector.load %arg3[%c0_13, %c0_14] : memref<2x128xf32, #tpu.memory_space<vmem>>, vector<2x128xf32>
    tpu.vector_store %arg3[%c0_13, %c0_14], %30 {strides = array<i32>} : memref<2x128xf32, #tpu.memory_space<vmem>>, vector<2x128xf32>,
    return
  }
  func.func @transform_0(%arg0: i32) -> (i32, i32) {
    %c0_i32 = arith.constant 0 : i32
    %c0_i32_0 = arith.constant 0 : i32
    return %c0_i32, %arg0 : i32, i32
  }
  func.func @transform_1(%arg0: i32) -> (i32, i32) {
    %c0_i32 = arith.constant 0 : i32
    %c0_i32_0 = arith.constant 0 : i32
    %c0_i32_1 = arith.constant 0 : i32
    return %c0_i32, %c0_i32_0 : i32, i32
  }
  func.func @transform_2(%arg0: i32) -> (i32, i32) {
    %c0_i32 = arith.constant 0 : i32
    %c0_i32_0 = arith.constant 0 : i32
    return %c0_i32, %arg0 : i32, i32
  }
}

</mosaic_0001>

<bundles_post_ra>
// kernel: tpu_custom_call.1
= control target key start
LH: loop header
LB: loop body
LE: loop exit
PB: predicated region body
PF: predicated region fallthrough
CT: control target
= control target key end

     0   :  { %7 = vsyncpa [#allocation3], 0  ;;  %s600_s0 = inlined_call_operand.hbm [shape: f32[2,128], index: 0, kind: input, shape index: {}]   ;;  %s601_s1 = inlined_call_operand.hbm [shape: f32[72,128], index: 1, kind: input, shape index: {}]   ;;  %s602_s2 = inlined_call_operand.hbm [shape: f32[2,128], index: 2, kind: output, shape index: {}]  }
   0x1   :  { %8 = vsyncpa [#allocation6], 0 }
   0x2   :  { %9 = vsyncpa [#allocation4], 0  ;;  %s514_s9 = smov [#allocation2]   ;;  %s515_s11 = smov [#allocation5]  }
   0x3   :  { %s16_s10 = sshll.u32 %s514_s9, 4  ;;  %s25_s12 = sshll.u32 %s515_s11, 4  ;;  %s17_s10 = int_to_ptr.vmem [resolvable:$true] %s16_s10  ;;  %s542_s12 = int_to_ptr.vmem [resolvable:$true] %s25_s12 }
   0x4   :  { %s442_s15 = scalar_lea.hbm %s600_s0, 32 }
   0x5   :  { %p443_p0 = scmp.ne.s32.totalorder %s600_s0, %s442_s15  ;;  %p446_p1 = scmp.lt.u32.totalorder %s442_s15, %s600_s0 }
   0x7   :  { %p448_p2 = pnand %p446_p1, %p443_p0 }
   0x9   :  { %451 = shalt.err (!%p448_p2)
}
   0xa   :  { %s452_s20 = scalar_lea.vmem %s17_s10, 32  ;;  %p457_p4 = scmp.lt.s32.totalorder %s17_s10, %s17_s10 }
   0xb   :  { %p453_p3 = scmp.ne.s32.totalorder %s17_s10, %s452_s20  ;;  %p458_p5 = scmp.lt.s32.totalorder %s452_s20, %s452_s20 }
   0xd   :  { %p459_p6 = por %p458_p5, %p457_p4 }
   0xf   :  { %p460_p7 = pnand %p459_p6, %p453_p3 }
  0x11   :  { %463 = shalt.err (!%p460_p7)
}
  0x12   :  { %19 = dma.hbm_to_vmem [thread:$0]  %s600_s0, 32, %s17_s10, [#allocation3]  }
  0x13   :  { %s464_s25 = scalar_lea.hbm %s601_s1, 1152 }
  0x14   :  { %p465_p8 = scmp.ne.s32.totalorder %s601_s1, %s464_s25  ;;  %p468_p9 = scmp.lt.u32.totalorder %s464_s25, %s601_s1 }
  0x16   :  { %p470_p10 = pnand %p468_p9, %p465_p8 }
  0x18   :  { %473 = shalt.err (!%p470_p10)
}
  0x19   :  { %s474_s30 = scalar_lea.vmem %s542_s12, 1152  ;;  %p479_p12 = scmp.lt.s32.totalorder %s542_s12, %s542_s12 }
  0x1a   :  { %p475_p11 = scmp.ne.s32.totalorder %s542_s12, %s474_s30  ;;  %p480_p13 = scmp.lt.s32.totalorder %s474_s30, %s474_s30 }
  0x1c   :  { %p481_p0 = por %p480_p13, %p479_p12 }
  0x1e   :  { %p482_p1 = pnand %p481_p0, %p475_p11 }
  0x20   :  { %485 = shalt.err (!%p482_p1)
}
  0x21   :  { %s516_s0 = smov 128   ;;  %s517_s3 = smov 8  }
  0x22   :  { %31 = dma.hbm_to_vmem [thread:$0]  %s601_s1, 1152, %s542_s12, [#allocation6], %s516_s0, %s516_s0, %s517_s3  }
  0x23   :  { %508 = dma.done.wait [#allocation3], 32  }
  0x24   :  { %509 = vsyncadd [#allocation3], 4294967264 }
  0x25   :  { %510 = dma.done.wait [#allocation6], 1152  }
  0x26   :  { %511 = vsyncadd [#allocation6], 4294966144  ;;  %v518_v0 = vmov 1   ;;  %v519_v1 = vmov 0   ;;  %v39_v2 = vld [vmem:[#allocation5] sm:$0xff]  ;;  %v40_v3 = vld [vmem:[#allocation5 + $0x8] sm:$0xff]  ;;  %v63_v13 = vlaneseq }
  0x27   :  { %417 = vset.pattern.permute.xlu1 %v518_v0  ;;  %416 = vset.pattern.permute.xlu0 %v519_v1  ;;  %v41_v4 = vld [vmem:[#allocation5 + $0x10] sm:$0xff]  ;;  %v42_v5 = vld [vmem:[#allocation5 + $0x18] sm:$0xff]  ;;  %v520_v6 = vmov 2   ;;  %v123_v7 = vld [vmem:[#allocation5 + $0x20] sm:$0xff]  ;;  %vm147_vm0 = vcmask 261120   ;;  %v521_v9 = vmov 32  }
  0x28   :  { %72 = vperm.xlu1 %417, %v39_v2   ;;  %45 = vperm.xlu0 %416, %v39_v2   ;;  %v124_v8 = vld [vmem:[#allocation5 + $0x28] sm:$0xff]  ;;  %v125_v10 = vld [vmem:[#allocation5 + $0x30] sm:$0xff]  ;;  %v126_v11 = vld [vmem:[#allocation5 + $0x38] sm:$0xff]  ;;  %v64_v16 = vshrl.u32 %v63_v13, 7  ;;  %v522_v54 = vmov 0.0|0.0   ;;  %vm523_vm1 = vmmov 0  }
  0x29   :  { %372 = vmatprep.mubr.msk.f32.mxu0 %vm147_vm0, %v123_v7  ;;  %v574_v12 = vld [vmem:[#allocation5 + $0x40] sm:$0x3]  ;;  %v577_v21 = vld [vmem:[#allocation2] sm:$0x3]  ;;  %397 = vmatprep.subr.bf16.mxu1 %v522_v54  ;;  %v524_v55 = vmov 0.0   ;;  %v525_v56 = vmov 33  }
  0x2a   :  { %v89_v19 = vsub.s32 1, %v64_v16  ;;  %v65_v20 = vsub.s32 0, %v64_v16  ;;  %386 = vmatprep.mubr.msk.f32.mxu1 %vm523_vm1, %v524_v55  ;;  %s526_s1 = smov [#allocation7]  }
  0x2b   :  { %s336_s6 = sshll.u32 %s526_s1, 4  ;;  %s337_s6 = int_to_ptr.vmem [resolvable:$true] %s336_s6 }
  0x2c   :  { %76 = vperm.xlu1 %417, %v40_v3   ;;  %50 = vperm.xlu0 %416, %v40_v3   ;;  %v90_v24 = vrot.slane %v577_v21, %v89_v19  ;;  %v66_v25 = vrot.slane %v577_v21, %v65_v20  ;;  %s486_s7 = scalar_lea.vmem %s337_s6, 32  ;;  %p491_p3 = scmp.lt.s32.totalorder %s337_s6, %s337_s6 }
  0x2d   :  { %p487_p2 = scmp.ne.s32.totalorder %s337_s6, %s486_s7  ;;  %p492_p4 = scmp.lt.s32.totalorder %s486_s7, %s486_s7 }
  0x2f   :  { %p493_p5 = por %p492_p4, %p491_p3 }
  0x30   :  { %418 = vset.pattern.permute.xlu1 %v519_v1  ;;  %55 = vperm.xlu0 %416, %v41_v4  }
  0x31   :  { %60 = vperm.xlu1 %418, %v42_v5   ;;  %p494_p6 = pnand %p493_p5, %p487_p2 }
  0x34   :  { %419 = vset.pattern.permute.xlu0 %v518_v0 }
  0x35   :  { %420 = vset.pattern.permute.xlu1 %v518_v0  ;;  %80 = vperm.xlu0 %419, %v41_v4  }
  0x36   :  { %84 = vperm.xlu1 %420, %v42_v5  }
  0x39   :  { %422 = vset.pattern.permute.xlu0 %v520_v6 }
  0x3a   :  { %421 = vset.pattern.permute.xlu1 %v520_v6  ;;  %104 = vperm.xlu0 %422, %v40_v3  }
  0x3b   :  { %100 = vperm.xlu1 %421, %v39_v2  }
  0x3e   :  { %423 = vset.pattern.permute.xlu0 %v521_v9 }
  0x3f   :  { %108 = vperm.xlu1 %421, %v41_v4   ;;  %129 = vperm.xlu0 %423, %v123_v7  }
  0x43   :  { %112 = vperm.xlu1 %421, %v42_v5   ;;  %144 = vperm.xlu0 %423, %v126_v11  }
  0x47   :  { %424 = vset.pattern.permute.xlu1 %v521_v9  ;;  %425 = vset.pattern.permute.xlu0 %v525_v56 }
  0x48   :  { %134 = vperm.xlu1 %424, %v124_v8   ;;  %324 = vperm.xlu0 %425, %v574_v12  }
  0x4c   :  { %139 = vperm.xlu1 %424, %v125_v10  }
  0x50   :  { %248 = vperm.xlu1 %424, %v574_v12  }
  0xa7   :  { %v73_v14 = vpop.permute.xlu1 %72  ;;  %v46_v15 = vpop.permute.xlu0 %45 }
  0xa8   :  { %v91_v29 = vmul.f32 %v90_v24, %v73_v14  ;;  %v67_v30 = vmul.f32 %v66_v25, %v46_v15 }
  0xaa   :  { %v95_v34 = vadd.f32 %v91_v29, %v67_v30 }
  0xab   :  { %v77_v17 = vpop.permute.xlu1 %76  ;;  %v51_v18 = vpop.permute.xlu0 %50 }
  0xac   :  { %v92_v26 = vmul.f32 %v90_v24, %v77_v17  ;;  %v68_v27 = vmul.f32 %v66_v25, %v51_v18 }
  0xae   :  { %v96_v32 = vadd.f32 %v92_v26, %v68_v27 }
  0xaf   :  { %v56_v22 = vpop.permute.xlu0 %55 }
  0xb0   :  { %v61_v23 = vpop.permute.xlu1 %60  ;;  %v69_v39 = vmul.f32 %v66_v25, %v56_v22 }
  0xb1   :  { %v70_v43 = vmul.f32 %v66_v25, %v61_v23 }
  0xb4   :  { %v81_v28 = vpop.permute.xlu0 %80 }
  0xb5   :  { %v85_v31 = vpop.permute.xlu1 %84  ;;  %v93_v35 = vmul.f32 %v90_v24, %v81_v28 }
  0xb6   :  { %v94_v40 = vmul.f32 %v90_v24, %v85_v31 }
  0xb7   :  { %v97_v42 = vadd.f32 %v93_v35, %v69_v39 }
  0xb8   :  { %v98_v45 = vadd.f32 %v94_v40, %v70_v43 }
  0xb9   :  { %v105_v33 = vpop.permute.xlu0 %104 }
  0xba   :  { %v116_v36 = vadd.f32 %v105_v33, %v96_v32  ;;  %v101_v37 = vpop.permute.xlu1 %100 }
  0xbb   :  { %v115_v38 = vadd.f32 %v101_v37, %v95_v34 }
  0xbc   :  { %426 = vtanh.f32 %v116_v36 }
  0xbd   :  { %428 = vtanh.f32 %v115_v38 }
  0xbe   :  { %v109_v41 = vpop.permute.xlu1 %108  ;;  %v130_v57 = vpop.permute.xlu0 %129 }
  0xbf   :  { %v117_v44 = vadd.f32 %v109_v41, %v97_v42 }
  0xc1   :  { %430 = vtanh.f32 %v117_v44 }
  0xc2   :  { %v113_v46 = vpop.permute.xlu1 %112  ;;  %v145_v63 = vpop.permute.xlu0 %144 }
  0xc3   :  { %v118_v47 = vadd.f32 %v113_v46, %v98_v45 }
  0xc5   :  { %432 = vtanh.f32 %v118_v47 }
  0xc6   :  { %v427_v48 = vpop.eup %426 }
  0xc7   :  { %v429_v49 = vpop.eup %428  ;;  %v135_v58 = vpop.permute.xlu1 %134 }
  0xc8   :  { %v389_v50 = vpack.c.bf16 %v427_v48, %v429_v49 }
  0xca   :  { %390 = vmatprep.subr.bf16.mxu0 %v389_v50 }
  0xcb   :  { %392 = vmatpush3.bf16.msra.mxu0 %v389_v50  ;;  %v431_v51 = vpop.eup %430  ;;  %v140_v1 = vpop.permute.xlu1 %139 }
  0xcf   :  { %v433_v52 = vpop.eup %432  ;;  %v249_v14 = vpop.permute.xlu1 %248 }
  0xd0   :  { %v393_v53 = vpack.c.bf16 %v433_v52, %v431_v51 }
  0xd2   :  { %394 = vmatprep.subr.bf16.mxu0 %v393_v53 }
  0xd3   :  { %396 = vmatpush3.bf16.msra.mxu0 %v393_v53 }
  0xd6   :  { %373 = vmatmul.mubr.msk.f32.vlgmr.msra.gmra.mrb[0].mxu0 %vm147_vm0, %v124_v8 }
  0xd7   :  { %375 = vmatprep.mubr.msk.f32.mxu0 %vm147_vm0, %v125_v10 }
  0xda   :  { %376 = vmatmul.mubr.msk.f32.gmra.mrb[2].mxu0 %vm147_vm0, %v126_v11  ;;  %v325_v11 = vpop.permute.xlu0 %324 }
  0xdb   :  { %v327_v13 = vmul.f32 %v325_v11, %v577_v21 }
 0x1a9   :  { %v374_v59 = vpop.f32.mrb[0].mxu0 }
 0x1aa   :  { %v228_v60 = vadd.f32 %v374_v59, %v135_v58  ;;  %v222_v61 = vpop.f32.mrb[1].mxu0 }
 0x1ab   :  { %v223_v62 = vadd.f32 %v222_v61, %v130_v57 }
 0x1ac   :  { %434 = vtanh.f32 %v228_v60 }
 0x1ad   :  { %436 = vtanh.f32 %v223_v62  ;;  %v377_v0 = vpop.f32.mrb[2].mxu0 }
 0x1ae   :  { %v238_v2 = vadd.f32 %v377_v0, %v145_v63  ;;  %v232_v3 = vpop.f32.mrb[3].mxu0 }
 0x1af   :  { %v233_v4 = vadd.f32 %v232_v3, %v140_v1 }
 0x1b0   :  { %438 = vtanh.f32 %v238_v2 }
 0x1b1   :  { %440 = vtanh.f32 %v233_v4 }
 0x1b6   :  { %v435_v5 = vpop.eup %434 }
 0x1b7   :  { %v437_v6 = vpop.eup %436 }
 0x1b8   :  { %v398_v7 = vpack.c.bf16 %v435_v5, %v437_v6 }
 0x1ba   :  { %v439_v8 = vpop.eup %438  ;;  %399 = vmatpush3.bf16.msra.mxu1 %v398_v7 }
 0x1bb   :  { %v441_v9 = vpop.eup %440  ;;  %400 = vmatprep.subr.bf16.mxu1 %v522_v54 }
 0x1bc   :  { %v401_v10 = vpack.c.bf16 %v439_v8, %v441_v9 }
 0x1be   :  { %402 = vmatpush3.bf16.msra.mxu1 %v401_v10 }
 0x1c1   :  { %387 = vmatmul.mubr.msk.f32.vlgmr.msra.gmra.mrb[0].mxu1 %vm147_vm0, %v574_v12 }
 0x294   :  { %v319_v15 = vpop.f32.mrb[0].mxu1 }
 0x295   :  { %v320_v16 = vadd.f32 %v319_v15, %v249_v14  ;;  %v388_v17 = vpop.f32.mrb[1].mxu1 }
 0x297   :  { %v328_v18 = vadd.f32 %v327_v13, %v320_v16 }
 0x299   :  { %329 = vst [vmem:[#allocation7] sm:$0x3] %v328_v18 }
 0x29a   :  { %497 = shalt.err (!%p494_p6)
}
 0x29b   :  { %s498_s10 = scalar_lea.hbm %s602_s2, 32 }
 0x29c   :  { %p499_p7 = scmp.ne.s32.totalorder %s602_s2, %s498_s10  ;;  %p502_p8 = scmp.lt.u32.totalorder %s498_s10, %s602_s2 }
 0x29e   :  { %p504_p9 = pnand %p502_p8, %p499_p7 }
 0x2a0   :  { %507 = shalt.err (!%p504_p9)
}
 0x2a1   :  { %339 = dma.vmem_to_hbm [thread:$0]  %s337_s6, 32, %s602_s2, [#allocation4]  }
 0x2a2   :  { %512 = dma.done.wait [#allocation4], 32  }
 0x2a3   :  { %513 = vsyncadd [#allocation4], 4294967264 }
 0x2a4   :  { %343 = vsyncpa [#allocation3], 1 }
 0x2a5   :  { %344 = vsyncpa [#allocation6], 1 }
 0x2a6   :  { %345 = vsyncpa [#allocation4], 1 }

</bundles_post_ra>
